<compile_context>
chip_gen: v5e
topology: v5e:2x2
jax: 0.10.0
libtpu: 0.0.40
codegen_flags: <defaults>
</compile_context>

<pallas_src>
import functools

import jax
import jax.numpy as jnp
from jax.experimental import pallas as pl
from jax.experimental.pallas import tpu as pltpu

_LN_EPS = 1e-5


def _round_up(x, m):
    return ((x + m - 1) // m) * m


def _silu(x):
    return x * (1.0 / (1.0 + jnp.exp(-x)))


def _layernorm(x, gamma, beta):
    mean = jnp.mean(x, axis=-1, keepdims=True)
    var = jnp.mean((x - mean) ** 2, axis=-1, keepdims=True)
    return (x - mean) * jax.lax.rsqrt(var + _LN_EPS) * gamma + beta


# --------------------------------------------------------------------------
# Kernel 1: edge MLP + scatter-sum onto grid nodes.
# Grid: edge tiles ("arbitrary" — the aggregation output is revisited).
# --------------------------------------------------------------------------
def _edge_scatter_kernel(
    # scalar-prefetch (SMEM)
    src_ref, dst_ref,
    # VMEM inputs (edge tile pipelined; tables & weights resident)
    edge_ref, mesh_ref, grid_ref,
    ew1_ref, eb1_ref, ew2_ref, eb2_ref, eg_ref, ebeta_ref,
    # output: per-grid-node aggregation, resident accumulator
    agg_ref,
    # VMEM scratch
    srcg, dstg, eout,
    *, num_edges,
):
    step = pl.program_id(0)
    te = edge_ref.shape[0]
    base = step * te

    @pl.when(step == 0)
    def _init():
        agg_ref[...] = jnp.zeros_like(agg_ref)

    # ---- gather mesh[src], grid[dst] rows (SMEM indices -> VMEM row copies) ----
    def gather_body(e, carry):
        s = src_ref[base + e]
        d = dst_ref[base + e]
        srcg[pl.ds(e, 1), :] = mesh_ref[pl.ds(s, 1), :]
        dstg[pl.ds(e, 1), :] = grid_ref[pl.ds(d, 1), :]
        return carry

    jax.lax.fori_loop(0, te, gather_body, 0)

    # ---- edge MLP with the 3-way concat folded into one K=3H matmul ----
    edge = edge_ref[...]                                            # [TE, H]
    x = jnp.concatenate([edge, srcg[...], dstg[...]], axis=-1)      # [TE, 3H]
    h = jnp.dot(x, ew1_ref[...], preferred_element_type=jnp.float32) + eb1_ref[...]
    h = _silu(h)
    e_out = jnp.dot(h, ew2_ref[...], preferred_element_type=jnp.float32) + eb2_ref[...]
    e_out = _layernorm(e_out, eg_ref[...], ebeta_ref[...]) + edge   # edge residual

    # mask padded edge rows so they do not pollute the scatter-sum
    row_id = base + jax.lax.broadcasted_iota(jnp.int32, (te, 1), 0)
    e_out = jnp.where(row_id < num_edges, e_out, 0.0)
    eout[...] = e_out

    # ---- scatter-add edge outputs onto their destination grid nodes ----
    def scatter_body(e, carry):
        d = dst_ref[base + e]
        agg_ref[pl.ds(d, 1), :] = agg_ref[pl.ds(d, 1), :] + eout[pl.ds(e, 1), :]
        return carry

    jax.lax.fori_loop(0, te, scatter_body, 0)


# --------------------------------------------------------------------------
# Kernel 2: node MLP + decoder residual. Grid: grid-node tiles ("parallel").
# --------------------------------------------------------------------------
def _node_kernel(grid_ref, agg_ref, nw1_ref, nb1_ref, nw2_ref, nb2_ref,
                 ng_ref, nbeta_ref, out_ref):
    g = grid_ref[...]                                               # [TN, H]
    y = jnp.concatenate([g, agg_ref[...]], axis=-1)                 # [TN, 2H]
    h = jnp.dot(y, nw1_ref[...], preferred_element_type=jnp.float32) + nb1_ref[...]
    h = _silu(h)
    n = jnp.dot(h, nw2_ref[...], preferred_element_type=jnp.float32) + nb2_ref[...]
    n = _layernorm(n, ng_ref[...], nbeta_ref[...])
    out_ref[...] = g + n                                            # decoder residual


# --------------------------------------------------------------------------
# Wrapper
# --------------------------------------------------------------------------
def graphcast_decoder_forward(m2g_edge_feats, grid_feats, mesh_feats,
                              src_idx, dst_idx, params,
                              *, edge_tile=256, node_tile=256):
    E, H = m2g_edge_feats.shape
    Ng = grid_feats.shape[0]
    Nm = mesh_feats.shape[0]

    # Tile sizes: multiples of 8 (sublane constraint); remainders zero-padded.
    te = min(edge_tile, _round_up(E, 8))
    e_pad = _round_up(E, te)
    tn = min(node_tile, _round_up(Ng, 8))
    ng_pad = _round_up(Ng, tn)

    edge_p = jnp.zeros((e_pad, H), jnp.float32).at[:E].set(m2g_edge_feats)
    grid_p = jnp.zeros((ng_pad, H), jnp.float32).at[:Ng].set(grid_feats)
    src_p = jnp.zeros((e_pad,), jnp.int32).at[:E].set(src_idx.astype(jnp.int32))
    dst_p = jnp.zeros((e_pad,), jnp.int32).at[:E].set(dst_idx.astype(jnp.int32))

    rep = lambda i, src, dst: (0, 0)   # resident block: index never changes -> no re-DMA

    # ---------------- phase 1: edge MLP + scatter-sum ----------------
    agg = pl.pallas_call(
        functools.partial(_edge_scatter_kernel, num_edges=E),
        out_shape=jax.ShapeDtypeStruct((ng_pad, H), jnp.float32),
        grid_spec=pltpu.PrefetchScalarGridSpec(
            num_scalar_prefetch=2,
            grid=(e_pad // te,),
            in_specs=[
                pl.BlockSpec((te, H), lambda i, src, dst: (i, 0)),  # edge tile (pipelined)
                pl.BlockSpec((Nm, H), rep),                         # mesh gather table
                pl.BlockSpec((ng_pad, H), rep),                     # grid gather table
                pl.BlockSpec((3 * H, H), rep),                      # ew1
                pl.BlockSpec((1, H), rep),                          # eb1
                pl.BlockSpec((H, H), rep),                          # ew2
                pl.BlockSpec((1, H), rep),                          # eb2
                pl.BlockSpec((1, H), rep),                          # ln gamma
                pl.BlockSpec((1, H), rep),                          # ln beta
            ],
            out_specs=pl.BlockSpec((ng_pad, H), rep),               # resident accumulator
            scratch_shapes=[
                pltpu.VMEM((te, H), jnp.float32),                   # gathered mesh[src]
                pltpu.VMEM((te, H), jnp.float32),                   # gathered grid[dst]
                pltpu.VMEM((te, H), jnp.float32),                   # edge MLP output tile
            ],
        ),
        compiler_params=pltpu.CompilerParams(
            dimension_semantics=("arbitrary",)),
    )(src_p, dst_p, edge_p, mesh_feats, grid_p,
      params["ew1"], params["eb1"], params["ew2"], params["eb2"],
      params["eln_g"], params["eln_b"])

    # ---------------- phase 2: node MLP + residual ----------------
    w_rep = lambda i: (0, 0)
    out = pl.pallas_call(
        _node_kernel,
        out_shape=jax.ShapeDtypeStruct((ng_pad, H), jnp.float32),
        grid_spec=pltpu.PrefetchScalarGridSpec(
            num_scalar_prefetch=0,
            grid=(ng_pad // tn,),
            in_specs=[
                pl.BlockSpec((tn, H), lambda i: (i, 0)),            # grid tile
                pl.BlockSpec((tn, H), lambda i: (i, 0)),            # agg tile
                pl.BlockSpec((2 * H, H), w_rep),                    # nw1
                pl.BlockSpec((1, H), w_rep),                        # nb1
                pl.BlockSpec((H, H), w_rep),                        # nw2
                pl.BlockSpec((1, H), w_rep),                        # nb2
                pl.BlockSpec((1, H), w_rep),                        # ln gamma
                pl.BlockSpec((1, H), w_rep),                        # ln beta
            ],
            out_specs=pl.BlockSpec((tn, H), lambda i: (i, 0)),
        ),
        compiler_params=pltpu.CompilerParams(
            dimension_semantics=("parallel",)),                     # megacore on v7x
    )(grid_p, agg, params["nw1"], params["nb1"], params["nw2"], params["nb2"],
      params["nln_g"], params["nln_b"])

    return out[:Ng]


# ----------------------- pure-JAX reference (semantics check) -----------------------
def _reference(m2g_edge_feats, grid_feats, mesh_feats, src_idx, dst_idx, params):
    Ng = grid_feats.shape[0]
    src_g = mesh_feats[src_idx]
    dst_g = grid_feats[dst_idx]
    x = jnp.concatenate([m2g_edge_feats, src_g, dst_g], axis=-1)
    h = jax.nn.silu(jnp.dot(x, params["ew1"]) + params["eb1"])
    e = jnp.dot(h, params["ew2"]) + params["eb2"]
    e = _layernorm(e, params["eln_g"], params["eln_b"])
    e_feats = e + m2g_edge_feats
    agg = jax.ops.segment_sum(e_feats, dst_idx, num_segments=Ng)
    y = jnp.concatenate([grid_feats, agg], axis=-1)
    h2 = jax.nn.silu(jnp.dot(y, params["nw1"]) + params["nb1"])
    n = jnp.dot(h2, params["nw2"]) + params["nb2"]
    n = _layernorm(n, params["nln_g"], params["nln_b"])
    return grid_feats + n


# ----------------------- deterministic parameter init -----------------------
def _init_linear(key, fan_in, fan_out):
    kw, kb = jax.random.split(key)
    bound = 1.0 / float(fan_in) ** 0.5
    w = jax.random.uniform(kw, (fan_in, fan_out), jnp.float32, -bound, bound)
    b = jax.random.uniform(kb, (1, fan_out), jnp.float32, -bound, bound)
    return w, b


def init_params(key, hidden_dim):
    H = hidden_dim
    ks = jax.random.split(key, 4)
    ew1, eb1 = _init_linear(ks[0], 3 * H, H)
    ew2, eb2 = _init_linear(ks[1], H, H)
    nw1, nb1 = _init_linear(ks[2], 2 * H, H)
    nw2, nb2 = _init_linear(ks[3], H, H)
    ones = jnp.ones((1, H), jnp.float32)
    zeros = jnp.zeros((1, H), jnp.float32)
    return dict(
        ew1=ew1, eb1=eb1, ew2=ew2, eb2=eb2, eln_g=ones, eln_b=zeros,
        nw1=nw1, nb1=nb1, nw2=nw2, nb2=nb2, nln_g=ones, nln_b=zeros,
    )


if __name__ == "__main__":
    # Small synthetic shapes consistent with the module's forward signature.
    H = 32     # cfg.model.hidden_dim
    Nm = 16    # number of mesh nodes
    Ng = 24    # number of grid nodes
    E = 48     # number of mesh->grid edges

    key = jax.random.PRNGKey(0)
    k_p, k_e, k_g, k_m, k_s, k_d = jax.random.split(key, 6)

    params = init_params(k_p, H)
    m2g_edge_feats = jax.random.normal(k_e, (E, H), jnp.float32)
    grid_feats = jax.random.normal(k_g, (Ng, H), jnp.float32)
    mesh_feats = jax.random.normal(k_m, (Nm, H), jnp.float32)
    src_idx = jax.random.randint(k_s, (E,), 0, Nm, dtype=jnp.int32)
    dst_idx = jax.random.randint(k_d, (E,), 0, Ng, dtype=jnp.int32)

    # Small tile sizes so the example exercises multi-step pipelining and the
    # cross-tile scatter accumulation (3 edge tiles, 3 node tiles).
    out = graphcast_decoder_forward(m2g_edge_feats, grid_feats, mesh_feats,
                                    src_idx, dst_idx, params,
                                    edge_tile=16, node_tile=8)
    out = jax.block_until_ready(out)

    ref = _reference(m2g_edge_feats, grid_feats, mesh_feats, src_idx, dst_idx, params)
    assert out.shape == (Ng, H)
    assert jnp.allclose(out, ref, rtol=5e-2, atol=5e-2), (
        f"max abs diff {float(jnp.max(jnp.abs(out - ref)))}")
    print("KERNEL_OK")
</pallas_src>

<mosaic_0001>
module attributes {stable_mosaic.version = 11 : i64} {
  func.func @_edge_scatter_kernel(%arg0: i32, %arg1: memref<48xi32, #tpu.memory_space<smem>>, %arg2: memref<48xi32, #tpu.memory_space<smem>>, %arg3: memref<16x32xf32, #tpu.memory_space<vmem>>, %arg4: memref<16x32xf32, #tpu.memory_space<vmem>>, %arg5: memref<24x32xf32, #tpu.memory_space<vmem>>, %arg6: memref<96x32xf32, #tpu.memory_space<vmem>>, %arg7: memref<1x32xf32, #tpu.memory_space<vmem>>, %arg8: memref<32x32xf32, #tpu.memory_space<vmem>>, %arg9: memref<1x32xf32, #tpu.memory_space<vmem>>, %arg10: memref<1x32xf32, #tpu.memory_space<vmem>>, %arg11: memref<1x32xf32, #tpu.memory_space<vmem>>, %arg12: memref<24x32xf32, #tpu.memory_space<vmem>>, %arg13: memref<16x32xf32, #tpu.memory_space<vmem>>, %arg14: memref<16x32xf32, #tpu.memory_space<vmem>>, %arg15: memref<16x32xf32, #tpu.memory_space<vmem>>) attributes {dimension_semantics = [#tpu.dimension_semantics<arbitrary>], iteration_bounds = array<i64: 3>, scalar_prefetch = 2 : i64, scratch_operands = 3 : i64, tpu.core_type = #tpu.core_type<tc>, window_params = [{transform_indices = @transform_0, window_bounds = array<i64: 16, 32>}, {pipeline_mode = #tpu.pipeline_mode<synchronous>, transform_indices = @transform_1, window_bounds = array<i64: 16, 32>}, {pipeline_mode = #tpu.pipeline_mode<synchronous>, transform_indices = @transform_2, window_bounds = array<i64: 24, 32>}, {pipeline_mode = #tpu.pipeline_mode<synchronous>, transform_indices = @transform_3, window_bounds = array<i64: 96, 32>}, {pipeline_mode = #tpu.pipeline_mode<synchronous>, transform_indices = @transform_4, window_bounds = array<i64: 1, 32>}, {pipeline_mode = #tpu.pipeline_mode<synchronous>, transform_indices = @transform_5, window_bounds = array<i64: 32, 32>}, {pipeline_mode = #tpu.pipeline_mode<synchronous>, transform_indices = @transform_6, window_bounds = array<i64: 1, 32>}, {pipeline_mode = #tpu.pipeline_mode<synchronous>, transform_indices = @transform_7, window_bounds = array<i64: 1, 32>}, {pipeline_mode = #tpu.pipeline_mode<synchronous>, transform_indices = @transform_8, window_bounds = array<i64: 1, 32>}, {pipeline_mode = #tpu.pipeline_mode<synchronous>, transform_indices = @transform_9, window_bounds = array<i64: 24, 32>}]} {
    %c16_i32 = arith.constant 16 : i32
    %0 = arith.muli %arg0, %c16_i32 : i32
    %c0_i32 = arith.constant 0 : i32
    %1 = arith.cmpi eq, %arg0, %c0_i32 : i32
    %2 = arith.extui %1 : i1 to i32
    %c0_i32_0 = arith.constant 0 : i32
    %3 = arith.cmpi ne, %2, %c0_i32_0 : i32
    scf.if %3 {
      %cst_37 = arith.constant 0.000000e+00 : f32
      %63 = vector.broadcast %cst_37 : f32 to vector<24x32xf32>
      %c0_38 = arith.constant 0 : index
      %c0_39 = arith.constant 0 : index
      %64 = vector.load %arg12[%c0_38, %c0_39] : memref<24x32xf32, #tpu.memory_space<vmem>>, vector<24x32xf32>
      tpu.vector_store %arg12[%c0_38, %c0_39], %63 {strides = array<i32>} : memref<24x32xf32, #tpu.memory_space<vmem>>, vector<24x32xf32>,
    } else {
    }
    %c0_i32_1 = arith.constant 0 : i32
    %c16_i32_2 = arith.constant 16 : i32
    %4 = arith.addi %c0_i32_1, %c16_i32_2 : i32
    %c1_i32 = arith.constant 1 : i32
    scf.for %arg16 = %c0_i32_1 to %4 step %c1_i32  : i32 {
      %63 = arith.addi %0, %arg16 : i32
      %64 = arith.index_cast %63 : i32 to index
      %65 = memref.load %arg1[%64] : memref<48xi32, #tpu.memory_space<smem>>
      %66 = arith.addi %0, %arg16 : i32
      %67 = arith.index_cast %66 : i32 to index
      %68 = memref.load %arg2[%67] : memref<48xi32, #tpu.memory_space<smem>>
      %69 = arith.index_cast %65 : i32 to index
      %c0_37 = arith.constant 0 : index
      %70 = vector.load %arg4[%69, %c0_37] : memref<16x32xf32, #tpu.memory_space<vmem>>, vector<1x32xf32>
      %71 = arith.index_cast %arg16 : i32 to index
      %c0_38 = arith.constant 0 : index
      %72 = vector.load %arg13[%71, %c0_38] : memref<16x32xf32, #tpu.memory_space<vmem>>, vector<1x32xf32>
      tpu.vector_store %arg13[%71, %c0_38], %70 {strides = array<i32>} : memref<16x32xf32, #tpu.memory_space<vmem>>, vector<1x32xf32>,
      %73 = arith.index_cast %68 : i32 to index
      %c0_39 = arith.constant 0 : index
      %74 = vector.load %arg5[%73, %c0_39] : memref<24x32xf32, #tpu.memory_space<vmem>>, vector<1x32xf32>
      %75 = arith.index_cast %arg16 : i32 to index
      %c0_40 = arith.constant 0 : index
      %76 = vector.load %arg14[%75, %c0_40] : memref<16x32xf32, #tpu.memory_space<vmem>>, vector<1x32xf32>
      tpu.vector_store %arg14[%75, %c0_40], %74 {strides = array<i32>} : memref<16x32xf32, #tpu.memory_space<vmem>>, vector<1x32xf32>,
    }
    %c16_i32_3 = arith.constant 16 : i32
    %c0 = arith.constant 0 : index
    %c0_4 = arith.constant 0 : index
    %5 = vector.load %arg3[%c0, %c0_4] : memref<16x32xf32, #tpu.memory_space<vmem>>, vector<16x32xf32>
    %c0_5 = arith.constant 0 : index
    %c0_6 = arith.constant 0 : index
    %6 = vector.load %arg13[%c0_5, %c0_6] : memref<16x32xf32, #tpu.memory_space<vmem>>, vector<16x32xf32>
    %c0_7 = arith.constant 0 : index
    %c0_8 = arith.constant 0 : index
    %7 = vector.load %arg14[%c0_7, %c0_8] : memref<16x32xf32, #tpu.memory_space<vmem>>, vector<16x32xf32>
    %8 = tpu.concatenate %5, %6, %7 in 1 : vector<16x32xf32>, vector<16x32xf32>, vector<16x32xf32> -> vector<16x96xf32>
    %c0_9 = arith.constant 0 : index
    %c0_10 = arith.constant 0 : index
    %9 = vector.load %arg6[%c0_9, %c0_10] : memref<96x32xf32, #tpu.memory_space<vmem>>, vector<96x32xf32>
    %cst = arith.constant dense<0.000000e+00> : vector<16x32xf32>
    %10 = tpu.matmul %8, %9, %cst {dimension_numbers = #tpu.dot_dimension_numbers<[1], [0], [0], [1], [0, 0, 1, 1], [], []>} : vector<16x96xf32>, vector<96x32xf32>, vector<16x32xf32> -> vector<16x32xf32>
    %c0_11 = arith.constant 0 : index
    %c0_12 = arith.constant 0 : index
    %11 = vector.load %arg7[%c0_11, %c0_12] : memref<1x32xf32, #tpu.memory_space<vmem>>, vector<1x32xf32>
    %12 = vector.broadcast %11 : vector<1x32xf32> to vector<16x32xf32>
    %13 = arith.addf %10, %12 : vector<16x32xf32>
    %cst_13 = arith.constant 0.000000e+00 : f32
    %14 = vector.broadcast %cst_13 : f32 to vector<16x32xf32>
    %15 = arith.subf %14, %13 : vector<16x32xf32>
    %16 = math.exp %15 : vector<16x32xf32>
    %cst_14 = arith.constant 1.000000e+00 : f32
    %17 = vector.broadcast %cst_14 : f32 to vector<16x32xf32>
    %18 = arith.addf %17, %16 : vector<16x32xf32>
    %cst_15 = arith.constant 1.000000e+00 : f32
    %19 = vector.broadcast %cst_15 : f32 to vector<16x32xf32>
    %20 = arith.divf %19, %18 : vector<16x32xf32>
    %21 = arith.mulf %13, %20 : vector<16x32xf32>
    %c0_16 = arith.constant 0 : index
    %c0_17 = arith.constant 0 : index
    %22 = vector.load %arg8[%c0_16, %c0_17] : memref<32x32xf32, #tpu.memory_space<vmem>>, vector<32x32xf32>
    %cst_18 = arith.constant dense<0.000000e+00> : vector<16x32xf32>
    %23 = tpu.matmul %21, %22, %cst_18 {dimension_numbers = #tpu.dot_dimension_numbers<[1], [0], [0], [1], [0, 0, 1, 1], [], []>} : vector<16x32xf32>, vector<32x32xf32>, vector<16x32xf32> -> vector<16x32xf32>
    %c0_19 = arith.constant 0 : index
    %c0_20 = arith.constant 0 : index
    %24 = vector.load %arg9[%c0_19, %c0_20] : memref<1x32xf32, #tpu.memory_space<vmem>>, vector<1x32xf32>
    %25 = vector.broadcast %24 : vector<1x32xf32> to vector<16x32xf32>
    %26 = arith.addf %23, %25 : vector<16x32xf32>
    %c0_21 = arith.constant 0 : index
    %c0_22 = arith.constant 0 : index
    %27 = vector.load %arg10[%c0_21, %c0_22] : memref<1x32xf32, #tpu.memory_space<vmem>>, vector<1x32xf32>
    %c0_23 = arith.constant 0 : index
    %c0_24 = arith.constant 0 : index
    %28 = vector.load %arg11[%c0_23, %c0_24] : memref<1x32xf32, #tpu.memory_space<vmem>>, vector<1x32xf32>
    %cst_25 = arith.constant dense<0.000000e+00> : vector<16xf32>
    %29 = vector.multi_reduction <add>, %26, %cst_25 [1] : vector<16x32xf32> to vector<16xf32>
    %30 = vector.shape_cast %29 : vector<16xf32> to vector<16x1xf32>
    %cst_26 = arith.constant 3.200000e+01 : f32
    %31 = vector.broadcast %cst_26 : f32 to vector<16x1xf32>
    %32 = arith.divf %30, %31 : vector<16x1xf32>
    %33 = vector.broadcast %32 : vector<16x1xf32> to vector<16x32xf32>
    %34 = arith.subf %26, %33 : vector<16x32xf32>
    %35 = arith.mulf %34, %34 : vector<16x32xf32>
    %cst_27 = arith.constant dense<0.000000e+00> : vector<16xf32>
    %36 = vector.multi_reduction <add>, %35, %cst_27 [1] : vector<16x32xf32> to vector<16xf32>
    %37 = vector.shape_cast %36 : vector<16xf32> to vector<16x1xf32>
    %cst_28 = arith.constant 3.200000e+01 : f32
    %38 = vector.broadcast %cst_28 : f32 to vector<16x1xf32>
    %39 = arith.divf %37, %38 : vector<16x1xf32>
    %40 = vector.broadcast %32 : vector<16x1xf32> to vector<16x32xf32>
    %41 = arith.subf %26, %40 : vector<16x32xf32>
    %cst_29 = arith.constant 9.99999974E-6 : f32
    %42 = vector.broadcast %cst_29 : f32 to vector<16x1xf32>
    %43 = arith.addf %39, %42 : vector<16x1xf32>
    %44 = math.rsqrt %43 : vector<16x1xf32>
    %45 = vector.broadcast %44 : vector<16x1xf32> to vector<16x32xf32>
    %46 = arith.mulf %41, %45 : vector<16x32xf32>
    %47 = vector.broadcast %27 : vector<1x32xf32> to vector<16x32xf32>
    %48 = arith.mulf %46, %47 : vector<16x32xf32>
    %49 = vector.broadcast %28 : vector<1x32xf32> to vector<16x32xf32>
    %50 = arith.addf %48, %49 : vector<16x32xf32>
    %51 = arith.addf %50, %5 : vector<16x32xf32>
    %52 = tpu.iota {dimensions = array<i32: 0>} : vector<16x1xi32>
    %53 = vector.broadcast %0 : i32 to vector<16x1xi32>
    %54 = arith.addi %53, %52 : vector<16x1xi32>
    %c48_i32 = arith.constant 48 : i32
    %55 = vector.broadcast %c48_i32 : i32 to vector<16x1xi32>
    %56 = arith.cmpi slt, %54, %55 : vector<16x1xi32>
    %cst_30 = arith.constant 0.000000e+00 : f32
    %57 = vector.shape_cast %56 : vector<16x1xi1> to vector<16x1xi1>
    %58 = vector.broadcast %57 : vector<16x1xi1> to vector<16x32xi1>
    %59 = vector.broadcast %cst_30 : f32 to vector<16x32xf32>
    %60 = arith.select %58, %51, %59 : vector<16x32xi1>, vector<16x32xf32>
    %c0_31 = arith.constant 0 : index
    %c0_32 = arith.constant 0 : index
    %61 = vector.load %arg15[%c0_31, %c0_32] : memref<16x32xf32, #tpu.memory_space<vmem>>, vector<16x32xf32>
    tpu.vector_store %arg15[%c0_31, %c0_32], %60 {strides = array<i32>} : memref<16x32xf32, #tpu.memory_space<vmem>>, vector<16x32xf32>,
    %c0_i32_33 = arith.constant 0 : i32
    %c16_i32_34 = arith.constant 16 : i32
    %62 = arith.addi %c0_i32_33, %c16_i32_34 : i32
    %c1_i32_35 = arith.constant 1 : i32
    scf.for %arg16 = %c0_i32_33 to %62 step %c1_i32_35  : i32 {
      %63 = arith.addi %0, %arg16 : i32
      %64 = arith.index_cast %63 : i32 to index
      %65 = memref.load %arg2[%64] : memref<48xi32, #tpu.memory_space<smem>>
      %66 = arith.index_cast %65 : i32 to index
      %c0_37 = arith.constant 0 : index
      %67 = vector.load %arg12[%66, %c0_37] : memref<24x32xf32, #tpu.memory_space<vmem>>, vector<1x32xf32>
      %68 = arith.index_cast %arg16 : i32 to index
      %c0_38 = arith.constant 0 : index
      %69 = vector.load %arg15[%68, %c0_38] : memref<16x32xf32, #tpu.memory_space<vmem>>, vector<1x32xf32>
      %70 = arith.addf %67, %69 : vector<1x32xf32>
      %71 = arith.index_cast %65 : i32 to index
      %c0_39 = arith.constant 0 : index
      %72 = vector.load %arg12[%71, %c0_39] : memref<24x32xf32, #tpu.memory_space<vmem>>, vector<1x32xf32>
      tpu.vector_store %arg12[%71, %c0_39], %70 {strides = array<i32>} : memref<24x32xf32, #tpu.memory_space<vmem>>, vector<1x32xf32>,
    }
    %c16_i32_36 = arith.constant 16 : i32
    return
  }
  func.func @transform_0(%arg0: i32, %arg1: memref<48xi32, #tpu.memory_space<smem>>, %arg2: memref<48xi32, #tpu.memory_space<smem>>) -> (i32, i32) {
    %c0_i32 = arith.constant 0 : i32
    %c0_i32_0 = arith.constant 0 : i32
    return %arg0, %c0_i32 : i32, i32
  }
  func.func @transform_1(%arg0: i32, %arg1: memref<48xi32, #tpu.memory_space<smem>>, %arg2: memref<48xi32, #tpu.memory_space<smem>>) -> (i32, i32) {
    %c0_i32 = arith.constant 0 : i32
    %c0_i32_0 = arith.constant 0 : i32
    %c0_i32_1 = arith.constant 0 : i32
    return %c0_i32, %c0_i32_0 : i32, i32
  }
  func.func @transform_2(%arg0: i32, %arg1: memref<48xi32, #tpu.memory_space<smem>>, %arg2: memref<48xi32, #tpu.memory_space<smem>>) -> (i32, i32) {
    %c0_i32 = arith.constant 0 : i32
    %c0_i32_0 = arith.constant 0 : i32
    %c0_i32_1 = arith.constant 0 : i32
    return %c0_i32, %c0_i32_0 : i32, i32
  }
  func.func @transform_3(%arg0: i32, %arg1: memref<48xi32, #tpu.memory_space<smem>>, %arg2: memref<48xi32, #tpu.memory_space<smem>>) -> (i32, i32) {
    %c0_i32 = arith.constant 0 : i32
    %c0_i32_0 = arith.constant 0 : i32
    %c0_i32_1 = arith.constant 0 : i32
    return %c0_i32, %c0_i32_0 : i32, i32
  }
  func.func @transform_4(%arg0: i32, %arg1: memref<48xi32, #tpu.memory_space<smem>>, %arg2: memref<48xi32, #tpu.memory_space<smem>>) -> (i32, i32) {
    %c0_i32 = arith.constant 0 : i32
    %c0_i32_0 = arith.constant 0 : i32
    %c0_i32_1 = arith.constant 0 : i32
    return %c0_i32, %c0_i32_0 : i32, i32
  }
  func.func @transform_5(%arg0: i32, %arg1: memref<48xi32, #tpu.memory_space<smem>>, %arg2: memref<48xi32, #tpu.memory_space<smem>>) -> (i32, i32) {
    %c0_i32 = arith.constant 0 : i32
    %c0_i32_0 = arith.constant 0 : i32
    %c0_i32_1 = arith.constant 0 : i32
    return %c0_i32, %c0_i32_0 : i32, i32
  }
  func.func @transform_6(%arg0: i32, %arg1: memref<48xi32, #tpu.memory_space<smem>>, %arg2: memref<48xi32, #tpu.memory_space<smem>>) -> (i32, i32) {
    %c0_i32 = arith.constant 0 : i32
    %c0_i32_0 = arith.constant 0 : i32
    %c0_i32_1 = arith.constant 0 : i32
    return %c0_i32, %c0_i32_0 : i32, i32
  }
  func.func @transform_7(%arg0: i32, %arg1: memref<48xi32, #tpu.memory_space<smem>>, %arg2: memref<48xi32, #tpu.memory_space<smem>>) -> (i32, i32) {
    %c0_i32 = arith.constant 0 : i32
    %c0_i32_0 = arith.constant 0 : i32
    %c0_i32_1 = arith.constant 0 : i32
    return %c0_i32, %c0_i32_0 : i32, i32
  }
  func.func @transform_8(%arg0: i32, %arg1: memref<48xi32, #tpu.memory_space<smem>>, %arg2: memref<48xi32, #tpu.memory_space<smem>>) -> (i32, i32) {
    %c0_i32 = arith.constant 0 : i32
    %c0_i32_0 = arith.constant 0 : i32
    %c0_i32_1 = arith.constant 0 : i32
    return %c0_i32, %c0_i32_0 : i32, i32
  }
  func.func @transform_9(%arg0: i32, %arg1: memref<48xi32, #tpu.memory_space<smem>>, %arg2: memref<48xi32, #tpu.memory_space<smem>>) -> (i32, i32) {
    %c0_i32 = arith.constant 0 : i32
    %c0_i32_0 = arith.constant 0 : i32
    %c0_i32_1 = arith.constant 0 : i32
    return %c0_i32, %c0_i32_0 : i32, i32
  }
}

</mosaic_0001>

<bundles_post_ra>
// kernel: tpu_custom_call.1
= control target key start
LH: loop header
LB: loop body
LE: loop exit
PB: predicated region body
PF: predicated region fallthrough
CT: control target
= control target key end

     0   :  { %s843_s23 = smov [#allocation6]   ;;  %s844_s24 = smov [#allocation7]   ;;  %s1037_s0 = inlined_call_operand.vmem [shape: s32[48], index: 0, kind: input, shape index: {}]   ;;  %s1038_s2 = inlined_call_operand.vmem [shape: f32[48,32], index: 2, kind: input, shape index: {}]   ;;  %s1039_s3 = inlined_call_operand.vmem [shape: f32[16,32], index: 3, kind: input, shape index: {}]   ;;  %s1040_s4 = inlined_call_operand.vmem [shape: f32[24,32], index: 4, kind: input, shape index: {}]   ;;  %s1041_s5 = inlined_call_operand.vmem [shape: f32[96,32], index: 5, kind: input, shape index: {}]   ;;  %s1042_s6 = inlined_call_operand.vmem [shape: f32[1,32], index: 6, kind: input, shape index: {}]   ;;  %s1043_s7 = inlined_call_operand.vmem [shape: f32[32,32], index: 7, kind: input, shape index: {}]   ;;  %s1044_s8 = inlined_call_operand.vmem [shape: f32[1,32], index: 8, kind: input, shape index: {}]   ;;  %s1045_s9 = inlined_call_operand.vmem [shape: f32[1,32], index: 9, kind: input, shape index: {}]   ;;  %s1046_s10 = inlined_call_operand.vmem [shape: f32[1,32], index: 10, kind: input, shape index: {}]   ;;  %s1047_s11 = inlined_call_operand.hbm [shape: f32[24,32], index: 11, kind: output, shape index: {}]   ;;  %s1048_s1 = inlined_call_operand.vmem [shape: s32[48], index: 1, kind: input, shape index: {}]  }
   0x1   :  { %s17_s19 = sshll.u32 %s1037_s0, 4  ;;  %s22_s22 = sshll.u32 %s1048_s1, 4  ;;  %s18_s19 = int_to_ptr.vmem [resolvable:$true] %s17_s19  ;;  %s23_s22 = int_to_ptr.vmem [resolvable:$true] %s22_s22 }
   0x2   :  { %20 = dma.vmem_to_smem %s18_s19, 16, %s843_s23, [#allocation5] }
   0x3   :  { %25 = dma.vmem_to_smem %s23_s22, 16, %s844_s24, [#allocation5] }
   0x4   :  { %825 = dma.done.wait [#allocation5], 32 }
   0x5   :  { %826 = vsyncadd [#allocation5], 4294967264 }
   0x6   :  { %28 = sfence }
   0x7   :  { %29 = vsyncpa [#allocation9], 0  ;;  %s918_s25 = smov 0  }
   0x8 LB: > { %s924_s0 = sadd.s32 4294967295, %s833_s25   ;;  %p679_p0 = scmp.ge.s32.totalorder %s833_s25, 1  ;;  %s833_s25 = sphi %s918_s25, %s35_s25  }
   0x9   : > { %p299_p1 = scmp.lt.s32.totalorder %s833_s25, 4 }
   0xb   : > { %p300_p2 = pnand %p679_p0, %p299_p1 }
   0xc   : > { %s680_s1 = sshll.u32 (!%p300_p2), %s924_s0, 1  ;;  %s930_s26 = sshll.u32 (!%p300_p2), %s924_s0, 4 }
   0xd   : > { %303 = sbr.rel (%p300_p2) target bundleno = 752 (0x2f0), region = 56  ;;  %p331_p3 = scmp.lt.s32.totalorder (!%p300_p2), %s680_s1, 5 }
   0xe   : > { %p683_p4 = scmp.ne.s32.totalorder (!%p300_p2), %s924_s0, 0 }
  0x12   : > { %s1050_s1 = smov (!%p331_p3, %s680_s1), 5  ;;  %340 = sbr.rel (%p683_p4) target bundleno = 27 (0x1b), region = 60 }
  0x13   : > { %s681_s27 = sshll.u32 %s1050_s1, 3 }
  0x14   : > { %s935_s30 = scalar_lea.vmem %s1038_s2, %s681_s27 }
  0x17   : > { %vm341_vm0 = vcmask 261120   ;;  %v845_v0 = vmov 0.0  }
  0x18   : > { %342 = vst.msk [vmem:[#allocation8] sm:$0xff] %vm341_vm0, %v845_v0 }
  0x19   : > { %343 = vst.msk [vmem:[#allocation8 + $0x8] sm:$0xff] %vm341_vm0, %v845_v0 }
  0x1a   : > { %344 = vst.msk [vmem:[#allocation8 + $0x10] sm:$0xff] %vm341_vm0, %v845_v0 }
  0x1b PF: > { %s835_s12 = smov 0  }
  0x1c LB: >> { %s351_s13 = sadd.s32 %s837_s12, %s930_s26  ;;  %vm357_vm1 = vcmask 253952   ;;  %s356_s22 = scalar_lea.vmem [#allocation2], %s837_s12  ;;  %s837_s12 = sphi %s835_s12, %s350_s12  }
  0x1d   : >> { %s352_s14 = sld [smem:[#allocation6 + %s351_s13]]  ;;  %s361_s23 = scalar_lea.vmem [#allocation3], %s837_s12 }
  0x1e   : >> { %s353_s15 = sld [smem:[#allocation7 + %s351_s13]]  ;;  %s350_s12 = sadd.s32 1, %s837_s12  }
  0x1f   : >> { %p347_p5 = scmp.ge.s32.totalorder %s350_s12, 16  }
  0x20   : > { %s846_s24 = smov (%p347_p5), 32   ;;  %v402_v5 = vld [vmem:[%s1041_s5 + $0x58] sm:$0xff] (%p347_p5)  ;;  %v401_v6 = vld [vmem:[%s1041_s5 + $0x50] sm:$0xff] (%p347_p5)  ;;  %v400_v7 = vld [vmem:[%s1041_s5 + $0x48] sm:$0xff] (%p347_p5)  ;;  %vm385_vm2 = vcmask (%p347_p5), 261120   ;;  %vm388_vm3 = vcmask (%p347_p5), 523264  }
  0x21   : > { %418 = vmatpush.msra.mxu0 (%p347_p5), %v402_v5  ;;  %692 = vmatpush.msra.mxu2 (%p347_p5), %v402_v5  ;;  %v399_v8 = vld [vmem:[%s1041_s5 + $0x40] sm:$0xff] (%p347_p5)  ;;  %v398_v11 = vld [vmem:[%s1041_s5 + $0x38] sm:$0xff] (%p347_p5)  ;;  %v397_v12 = vld [vmem:[%s1041_s5 + $0x30] sm:$0xff] (%p347_p5)  ;;  %vm407_vm4 = vcmask (%p347_p5), 785408   ;;  %s839_s12 = smov (%p347_p5), 0  }
  0x22   : > { %349 = sbr.rel (!%p347_p5) target bundleno = 28 (0x1c), region = 107  ;;  %v396_v13 = vld [vmem:[%s1041_s5 + $0x28] sm:$0xff] (%p347_p5)  ;;  %v395_v14 = vld [vmem:[%s1041_s5 + $0x20] sm:$0xff] (%p347_p5)  ;;  %v394_v15 = vld [vmem:[%s1041_s5 + $0x18] sm:$0xff] (%p347_p5) }
  0x23   : >> { %s354_s18 = scalar_lea.vmem %s1039_s3, %s352_s14  ;;  %419 = vmatpush.msra.mxu0 (%p347_p5), %v401_v6  ;;  %693 = vmatpush.msra.mxu2 (%p347_p5), %v401_v6  ;;  %v393_v16 = vld [vmem:[%s1041_s5 + $0x10] sm:$0xff] (%p347_p5)  ;;  %v392_v17 = vld [vmem:[%s1041_s5 + $0x8] sm:$0xff] (%p347_p5)  ;;  %v391_v18 = vld [vmem:[%s1041_s5] sm:$0xff] (%p347_p5) }
  0x24   : >> { %v355_v1 = vld [vmem:[%s354_s18] sm:$0x1]  ;;  %s359_s21 = scalar_lea.vmem %s1040_s4, %s353_s15  ;;  %s847_s18 = smov (%p347_p5), 64   ;;  %v984_v21 = vld [vmem:[%s935_s30 + $0x8] sm:$0xff] (%p347_p5)  ;;  %v480_v29 = vld [vmem:[%s1043_s7 + $0x18] sm:$0xff] (%p347_p5) }
  0x25   : >> { %358 = vst.msk [vmem:[%s356_s22] sm:$0x1] %vm357_vm1, %v355_v1  ;;  %v360_v2 = vld [vmem:[%s359_s21] sm:$0x1]  ;;  %420 = vmatpush.msra.mxu0 (%p347_p5), %v400_v7  ;;  %694 = vmatpush.msra.mxu2 (%p347_p5), %v400_v7  ;;  %v479_v31 = vld [vmem:[%s1043_s7 + $0x10] sm:$0xff] (%p347_p5)  ;;  %v478_v32 = vld [vmem:[%s1043_s7 + $0x8] sm:$0xff] (%p347_p5) }
  0x26   : >> { %362 = vst.msk [vmem:[%s361_s23] sm:$0x1] %vm357_vm1, %v360_v2  ;;  %v987_v22 = vld [vmem:[%s935_s30] sm:$0xff] (%p347_p5)  ;;  %503 = vmatpush.msra.mxu1 (%p347_p5), %v480_v29 }
  0x27   : > { %421 = vmatpush.msra.mxu0 %v399_v8  ;;  %695 = vmatpush.msra.mxu2 %v399_v8  ;;  %v743_v30 = vld [vmem:[%s1042_s6] ss:$0 sm:$0xff] }
  0x28   : > { %504 = vmatpush.msra.mxu1 %v479_v31  ;;  %v477_v35 = vld [vmem:[%s1043_s7] sm:$0xff] }
  0x29   : > { %422 = vmatpush.msra.mxu0 %v398_v11  ;;  %696 = vmatpush.msra.mxu2 %v398_v11  ;;  %v848_v11 = vmov 32.0  }
  0x2a   : > { %505 = vmatpush.msra.mxu1 %v478_v32 }
  0x2b   : > { %423 = vmatpush.msra.mxu0 %v397_v12  ;;  %697 = vmatpush.msra.mxu2 %v397_v12 }
  0x2c   : > { %v366_v3 = vld [vmem:[#allocation2 + $0x8] sm:$0xff]  ;;  %v365_v4 = vld [vmem:[#allocation2] sm:$0xff]  ;;  %506 = vmatpush.msra.mxu1 %v477_v35 }
  0x2d   : > { %373 = vrot.lane.b32.xlu1 %v366_v3, %s846_s24  ;;  %371 = vrot.lane.b32.xlu0 %v365_v4, %s846_s24  ;;  %v368_v9 = vld [vmem:[#allocation3 + $0x8] sm:$0xff]  ;;  %v367_v10 = vld [vmem:[#allocation3] sm:$0xff]  ;;  %v744_v4 = vld [vmem:[%s1044_s8] ss:$0 sm:$0xff] }
  0x2e   : > { %424 = vmatpush.msra.mxu0 %v396_v13  ;;  %698 = vmatpush.msra.mxu2 %v396_v13 }
  0x30   : > { %425 = vmatpush.msra.mxu0 %v395_v14  ;;  %699 = vmatpush.msra.mxu2 %v395_v14 }
  0x32   : > { %426 = vmatpush.msra.mxu0 %v394_v15  ;;  %700 = vmatpush.msra.mxu2 %v394_v15 }
  0x34   : > { %427 = vmatpush.msra.mxu0 %v393_v16  ;;  %701 = vmatpush.msra.mxu2 %v393_v16 }
  0x35   : > { %381 = vrot.lane.b32.xlu1 %v368_v9, %s847_s18  ;;  %379 = vrot.lane.b32.xlu0 %v367_v10, %s847_s18 }
  0x36   : > { %428 = vmatpush.msra.mxu0 %v392_v17  ;;  %702 = vmatpush.msra.mxu2 %v392_v17 }
  0x38   : > { %429 = vmatpush.msra.mxu0 %v391_v18  ;;  %703 = vmatpush.msra.mxu2 %v391_v18 }
  0x9f   : > { %v374_v19 = vpop.permute.xlu1 %373  ;;  %v372_v20 = vpop.permute.xlu0 %371 }
  0xa0   : > { %v387_v23 = vsel %vm385_vm2, %v984_v21, %v374_v19  ;;  %v386_v24 = vsel %vm385_vm2, %v987_v22, %v372_v20 }
  0xa7   : > { %v382_v25 = vpop.permute.xlu1 %381  ;;  %v380_v26 = vpop.permute.xlu0 %379 }
  0xa8   : > { %v389_v27 = vsel %vm388_vm3, %v386_v24, %v380_v26  ;;  %v390_v28 = vsel %vm388_vm3, %v387_v23, %v382_v25 }
  0xa9   : > { %684 = vmatmul.msk.f32.vlgmr.msra.gmra.mxu0 %vm407_vm4, %v389_v27  ;;  %685 = vmatmul.msk.f32.vlgmr.msra.gmra.mxu2 %vm407_vm4, %v390_v28 }
 0x126   : > { %v431_v33 = vpop.f32.mrf.mxu0 }
 0x127   : > { %v432_v34 = vadd.f32 %v743_v30, %v431_v33 }
 0x129   : > { %v437_v36 = vsub.f32 0.0, %v432_v34 }
 0x12b   : > { %v439_v37 = vmul.f32 1.442695, %v437_v36 }
 0x12c   : > { %v434_v38 = vpop.f32.mrf.mxu2 }
 0x12d   : > { %747 = vpow2.f32 %v439_v37  ;;  %v435_v39 = vadd.f32 %v743_v30, %v434_v38 }
 0x12f   : > { %v438_v40 = vsub.f32 0.0, %v435_v39 }
 0x131   : > { %v441_v41 = vmul.f32 1.442695, %v438_v40 }
 0x133   : > { %v748_v42 = vpop.eup %747  ;;  %749 = vpow2.f32 %v441_v41 }
 0x134   : > { %v443_v43 = vadd.f32 1.0, %v748_v42 }
 0x136   : > { %751 = vrcp.f32 %v443_v43  ;;  %v456_v49 = vand.u32 2147483648, %v443_v43  ;;  %v454_v51 = vand.u32 2147483647, %v443_v43  ;;  %vm450_vm6 = vweird.f32 %v443_v43 }
 0x138   : > { %v457_v55 = vor.u32 1.1754944e-38, %v456_v49  ;;  %vm455_vm8 = vcmp.eq.f32.partialorder %v454_v51, 8.507059e+37 }
 0x139   : > { %v750_v44 = vpop.eup %749 }
 0x13a   : > { %v444_v45 = vadd.f32 1.0, %v750_v44 }
 0x13c   : > { %v752_v46 = vpop.eup %751  ;;  %753 = vrcp.f32 %v444_v45  ;;  %v471_v59 = vand.u32 2147483648, %v444_v45  ;;  %v469_v62 = vand.u32 2147483647, %v444_v45  ;;  %vm465_vm10 = vweird.f32 %v444_v45 }
 0x13d   : > { %v446_v47 = vmul.f32 %v752_v46, %v443_v43  ;;  %vm451_vm5 = vweird.f32 %v752_v46  ;;  %755 = vrcp.f32 %v848_v11 }
 0x13e   : > { %vm452_vm7 = vmor %vm450_vm6, %vm451_vm5  ;;  %v472_v0 = vor.u32 1.1754944e-38, %v471_v59  ;;  %vm470_vm12 = vcmp.eq.f32.partialorder %v469_v62, 8.507059e+37 }
 0x13f   : > { %v447_v48 = vsub.f32 1.0, %v446_v47  ;;  %v582_v47 = vstv %s930_s26 }
 0x141   : > { %v448_v50 = vmul.f32 %v752_v46, %v447_v48 }
 0x142   : > { %v754_v52 = vpop.eup %753 }
 0x143   : > { %v449_v53 = vadd.f32 %v752_v46, %v448_v50  ;;  %v461_v54 = vmul.f32 %v754_v52, %v444_v45  ;;  %vm466_vm9 = vweird.f32 %v754_v52  ;;  %v756_v12 = vpop.eup %755  ;;  %v746_v50 = vld [vmem:[%s1046_s10] ss:$0 sm:$0xff] }
 0x144   : > { %vm467_vm11 = vmor %vm465_vm10, %vm466_vm9  ;;  %v523_v13 = vmul.f32 32.0, %v756_v12  ;;  %vm527_vm13 = vweird.f32 %v756_v12 }
 0x145   : > { %v453_v56 = vsel %vm452_vm7, %v752_v46, %v449_v53  ;;  %v462_v57 = vsub.f32 1.0, %v461_v54  ;;  %v745_v46 = vld [vmem:[%s1045_s9] ss:$0 sm:$0xff] }
 0x146   : > { %v458_v58 = vsel %vm455_vm8, %v457_v55, %v453_v56  ;;  %v524_v14 = vsub.f32 1.0, %v523_v13 }
 0x147   : > { %v475_v60 = vmul.f32 %v458_v58, %v432_v34  ;;  %v463_v61 = vmul.f32 %v754_v52, %v462_v57 }
 0x148   : > { %v525_v15 = vmul.f32 %v756_v12, %v524_v14 }
 0x149   : > { %v464_v63 = vadd.f32 %v754_v52, %v463_v61  ;;  %686 = vmatmul.msk.f32.vlgmr.msra.gmra.mxu1 %vm385_vm2, %v475_v60 }
 0x14a   : > { %v526_v16 = vadd.f32 %v756_v12, %v525_v15 }
 0x14b   : > { %v468_v1 = vsel %vm467_vm11, %v754_v52, %v464_v63 }
 0x14c   : > { %v473_v2 = vsel %vm470_vm12, %v472_v0, %v468_v1  ;;  %v528_v17 = vsel %vm527_vm13, %v756_v12, %v526_v16 }
 0x14d   : > { %v476_v3 = vmul.f32 %v473_v2, %v435_v39  ;;  %v579_v39 = vlaneseq }
 0x14f   : > { %v580_v43 = vshrl.u32 %v579_v39, 7 }
 0x151   : > { %687 = vmatmul.msk.f32.gmra.mxu1 %vm385_vm2, %v476_v3  ;;  %v583_v52 = vadd.s32 %v582_v47, %v580_v43  ;;  %v581_v57 = vadd.s32 8, %v580_v43 }
 0x153   : > { %vm585_vm4 = vcmp.lt.s32.totalorder %v583_v52, 48  ;;  %v584_v63 = vadd.s32 %v582_v47, %v581_v57 }
 0x155   : > { %vm586_vm7 = vcmp.lt.s32.totalorder %v584_v63, 48 }
 0x1c6   : > { %v508_v5 = vpop.f32.mrf.mxu1 }
 0x1c7   : > { %v509_v6 = vadd.f32 %v744_v4, %v508_v5 }
 0x1c9   : > { %v516_v7 = vsel %vm385_vm2, %v509_v6, 0.0 }
 0x1ca   : > { %517 = vadd.xlane.f32.xlu2 %v516_v7 }
 0x1ce   : > { %v511_v8 = vpop.f32.mrf.mxu1 }
 0x1cf   : > { %v512_v9 = vadd.f32 %v744_v4, %v511_v8 }
 0x1d1   : > { %v519_v10 = vsel %vm385_vm2, %v512_v9, 0.0 }
 0x1d2   : > { %520 = vadd.xlane.f32.xlu2 %v519_v10 }
 0x23d   : > { %v518_v18 = vpop.xlane.xlu2 %517 }
 0x23e   : > { %v529_v19 = vmul.f32 %v528_v17, %v518_v18 }
 0x240   : > { %v531_v20 = vsub.f32 %v509_v6, %v529_v19 }
 0x242   : > { %v533_v23 = vmul.f32 %v531_v20, %v531_v20 }
 0x244   : > { %v535_v24 = vsel %vm385_vm2, %v533_v23, 0.0 }
 0x245   : > { %536 = vadd.xlane.f32.xlu0 %v535_v24  ;;  %v521_v25 = vpop.xlane.xlu2 %520 }
 0x246   : > { %v530_v26 = vmul.f32 %v528_v17, %v521_v25 }
 0x248   : > { %v532_v27 = vsub.f32 %v512_v9, %v530_v26 }
 0x24a   : > { %v534_v28 = vmul.f32 %v532_v27, %v532_v27 }
 0x24c   : > { %v538_v29 = vsel %vm385_vm2, %v534_v28, 0.0 }
 0x24d   : > { %539 = vadd.xlane.f32.xlu1 %v538_v29 }
 0x2b8   : > { %v537_v30 = vpop.xlane.xlu0 %536 }
 0x2b9   : > { %v541_v31 = vmul.f32 %v537_v30, %v528_v17 }
 0x2bb   : > { %v543_v32 = vadd.f32 1e-05, %v541_v31 }
 0x2bd   : > { %757 = vrsqrt.f32 %v543_v32  ;;  %vm551_vm15 = vweird.f32 %v543_v32 }
 0x2c0   : > { %v540_v33 = vpop.xlane.xlu1 %539 }
 0x2c1   : > { %v542_v34 = vmul.f32 %v540_v33, %v528_v17 }
 0x2c3   : > { %v758_v35 = vpop.eup %757  ;;  %v544_v36 = vadd.f32 1e-05, %v542_v34 }
 0x2c4   : > { %v546_v37 = vmul.f32 %v758_v35, %v543_v32  ;;  %vm552_vm14 = vweird.f32 %v758_v35 }
 0x2c5   : > { %759 = vrsqrt.f32 %v544_v36  ;;  %vm553_vm0 = vmor %vm551_vm15, %vm552_vm14  ;;  %vm561_vm5 = vweird.f32 %v544_v36 }
 0x2c6   : > { %v547_v38 = vmul.f32 %v758_v35, %v546_v37 }
 0x2c8   : > { %v548_v40 = vmul.f32 0.5, %v547_v38 }
 0x2ca   : > { %v549_v41 = vsub.f32 1.5, %v548_v40 }
 0x2cb   : > { %v760_v42 = vpop.eup %759 }
 0x2cc   : > { %v550_v44 = vmul.f32 %v758_v35, %v549_v41  ;;  %v556_v45 = vmul.f32 %v760_v42, %v544_v36  ;;  %vm562_vm3 = vweird.f32 %v760_v42 }
 0x2cd   : > { %vm563_vm6 = vmor %vm561_vm5, %vm562_vm3 }
 0x2ce   : > { %v554_v48 = vsel %vm553_vm0, %v758_v35, %v550_v44  ;;  %v557_v49 = vmul.f32 %v760_v42, %v556_v45 }
 0x2cf   : > { %v565_v51 = vmul.f32 %v554_v48, %v531_v20 }
 0x2d0   : > { %v558_v53 = vmul.f32 0.5, %v557_v49 }
 0x2d1   : > { %v570_v54 = vmul.f32 %v745_v46, %v565_v51 }
 0x2d2   : > { %v559_v55 = vsub.f32 1.5, %v558_v53 }
 0x2d3   : > { %v575_v56 = vadd.f32 %v746_v50, %v570_v54 }
 0x2d4   : > { %v560_v58 = vmul.f32 %v760_v42, %v559_v55 }
 0x2d5   : > { %v577_v59 = vadd.f32 %v575_v56, %v987_v22 }
 0x2d6   : > { %v564_v60 = vsel %vm563_vm6, %v760_v42, %v560_v58 }
 0x2d7   : > { %v591_v61 = vsel %vm585_vm4, %v577_v59, 0.0  ;;  %v566_v62 = vmul.f32 %v564_v60, %v532_v27 }
 0x2d8   : > { %593 = vst.msk [vmem:[#allocation4] sm:$0xff] %vm385_vm2, %v591_v61 }
 0x2d9   : > { %v571_v0 = vmul.f32 %v745_v46, %v566_v62 }
 0x2db   : > { %v576_v1 = vadd.f32 %v746_v50, %v571_v0 }
 0x2dd   : > { %v578_v2 = vadd.f32 %v576_v1, %v984_v21 }
 0x2df   : > { %v592_v3 = vsel %vm586_vm7, %v578_v2, 0.0 }
 0x2e0   : > { %594 = vst.msk [vmem:[#allocation4 + $0x8] sm:$0xff] %vm385_vm2, %v592_v3 }
 0x2e1 LB: >> { %s601_s15 = sadd.s32 %s841_s12, %s930_s26  ;;  %s605_s17 = scalar_lea.vmem [#allocation4], %s841_s12  ;;  %s841_s12 = sphi %s839_s12, %s600_s12  }
 0x2e2   : >> { %s602_s16 = sld [smem:[#allocation7 + %s601_s15]]  ;;  %s600_s12 = sadd.s32 1, %s841_s12  }
 0x2e3   : >> { %p597_p6 = scmp.ge.s32.totalorder %s600_s12, 16  }
 0x2e4   : > { %p708_p7 = scmp.eq.s32.totalorder (%p597_p6), %s924_s0, 2  ;;  %s617_s20 = sshll.u32 (%p597_p6), %s1047_s11, 4  ;;  %s618_s20 = int_to_ptr.hbm [resolvable:$true] %s617_s20 }
 0x2e5   : > { %s849_s21 = smov (%p597_p6), [#allocation8]   ;;  %s850_s23 = smov (%p597_p6), 128  }
 0x2e6   : > { %s615_s22 = sshll.u32 (%p597_p6), %s849_s21, 4  ;;  %s851_s24 = smov (%p597_p6), 8   ;;  %s616_s22 = int_to_ptr.vmem [resolvable:$true] %s615_s22 }
 0x2e7   : >> { %v606_v22 = vld [vmem:[%s605_s17] sm:$0x1] }
 0x2e8   : >> { %s603_s30 = scalar_lea.vmem [#allocation8], %s602_s16  ;;  %599 = sbr.rel (!%p597_p6) target bundleno = 737 (0x2e1), region = 118 }
 0x2e9   : >> { %v604_v4 = vld [vmem:[%s603_s30] sm:$0x1] }
 0x2ea   : >> { %v607_v5 = vadd.f32 %v606_v22, %v604_v4 }
 0x2ec   : >> { %609 = vst.msk [vmem:[%s603_s30] sm:$0x1] %vm357_vm1, %v607_v5 }
 0x2ed   : > { %705 = dma.vmem_to_hbm [thread:$0]  (%p708_p7), %s616_s22, 384, %s618_s20, [#allocation9], %s850_s23, %s850_s23, %s851_s24  }
 0x2ee   : > { %828 = dma.done.wait (%p708_p7), [#allocation9], 384  }
 0x2ef   : > { %830 = vsyncadd (%p708_p7), [#allocation9], 4294966912 }
 0x2f0 PF: > { %s35_s25 = sadd.s32 1, %s833_s25  }
 0x2f1   : > { %p32_p8 = scmp.ge.s32.totalorder %s35_s25, 5  }
 0x2f3   :  { %34 = sbr.rel (!%p32_p8) target bundleno = 8 (0x8), region = 129 }
 0x2f8   :  { %634 = vsyncpa [#allocation9], 1 }
 0x2f9   :  { %636 = vsyncpa [#allocation9 + $0x1], 1 }

</bundles_post_ra>
